<compile_context>
chip_gen: v6e
topology: v6e:2x2x1
jax: 0.10.0
libtpu: 0.0.40
codegen_flags: <defaults>
</compile_context>

<pallas_src>
import jax
import jax.numpy as jnp
from jax import lax
from jax.experimental import pallas as pl
from jax.experimental.pallas import tpu as pltpu

EPS = 1e-5  # PyTorch nn.LayerNorm default

# Row layout of the packed (16, D) small-parameter array.
_ROW_W_X1, _ROW_W_X2, _ROW_W_Y1, _ROW_W_Y2, _ROW_W_AREA = 0, 1, 2, 3, 4
_ROW_B_POS, _ROW_G_POS, _ROW_BETA_POS = 5, 6, 7
_ROW_B_FEAT, _ROW_G_FEAT, _ROW_BETA_FEAT = 8, 9, 10
_PACK_ROWS = 16  # padded to a sublane multiple


def _layer_norm(x, gamma, beta):
    mu = jnp.mean(x, axis=-1, keepdims=True)
    xc = x - mu
    var = jnp.mean(xc * xc, axis=-1, keepdims=True)
    inv = lax.rsqrt(var + EPS)
    return xc * inv * gamma + beta


def visual_embedding_kernel(feats_ref, pos_ref, w_feat_ref, pack_ref, order_ref, out_ref):
    feats = feats_ref[...]        # [rows, F] bf16
    pos = pos_ref[...]            # [rows, 4] f32
    pack = pack_ref[...]          # [16, D]   f32

    # --- feat_embedding: Linear(feat_dim, d_model) on the MXU (bf16 in, f32 acc) + LayerNorm ---
    fe = jnp.dot(feats, w_feat_ref[...], preferred_element_type=jnp.float32)
    fe = fe + pack[_ROW_B_FEAT:_ROW_B_FEAT + 1, :]
    fe = _layer_norm(fe,
                     pack[_ROW_G_FEAT:_ROW_G_FEAT + 1, :],
                     pack[_ROW_BETA_FEAT:_ROW_BETA_FEAT + 1, :])

    # --- absolute_vis_pos_embedding: area -> 5 VPU broadcast FMAs -> LayerNorm ---
    # pos layout (x1, x2, y1, y2); area = (y2 - y1) * (x2 - x1)
    x1 = pos[:, 0:1]
    x2 = pos[:, 1:2]
    y1 = pos[:, 2:3]
    y2 = pos[:, 3:4]
    area = (y2 - y1) * (x2 - x1)
    pe = (x1 * pack[_ROW_W_X1:_ROW_W_X1 + 1, :]
          + x2 * pack[_ROW_W_X2:_ROW_W_X2 + 1, :]
          + y1 * pack[_ROW_W_Y1:_ROW_W_Y1 + 1, :]
          + y2 * pack[_ROW_W_Y2:_ROW_W_Y2 + 1, :]
          + area * pack[_ROW_W_AREA:_ROW_W_AREA + 1, :]
          + pack[_ROW_B_POS:_ROW_B_POS + 1, :])
    pe = _layer_norm(pe,
                     pack[_ROW_G_POS:_ROW_G_POS + 1, :],
                     pack[_ROW_BETA_POS:_ROW_BETA_POS + 1, :])

    # --- sum with pre-combined (img + obj) order embeddings, tiled per row-block ---
    out_ref[...] = (fe + pe + order_ref[...]).astype(out_ref.dtype)


def _choose_b_tile(B, N, target_rows=512):
    """Number of batch elements folded per grid step.

    Constraints: b_tile divides B and b_tile*N is a multiple of 16 (safe sublane multiple for
    both bf16 and f32 blocks) unless the whole array is taken in one block.  Prefers >= 2 grid
    steps (v7x has two TensorCores) and ~target_rows MXU rows per step.
    """
    candidates = [bt for bt in range(1, B + 1)
                  if B % bt == 0 and (bt * N) % 16 == 0]
    if not candidates:
        return B  # single step over the full array: block == full dims, always legal
    multi = [bt for bt in candidates if B // bt >= 2]
    pool = multi if multi else candidates
    return min(pool, key=lambda bt: abs(bt * N - target_rows))


def _vmem_limit_bytes(rows, F, D):
    pad = lambda x, m: -(-x // m) * m
    need = (
        2 * rows * pad(F, 128) * 2            # feats tile (bf16), double-buffered
        + 2 * rows * 128 * 4                  # pos tile (4 lanes pad to 128), f32
        + 2 * pad(F, 16) * pad(D, 128) * 2    # w_feat (bf16), worst case double-buffered
        + 2 * _PACK_ROWS * pad(D, 128) * 4    # packed small params
        + 2 * rows * pad(D, 128) * 4          # order-embedding tile
        + 2 * rows * pad(D, 128) * 4          # output tile
        + 4 * rows * pad(D, 128) * 4          # fe / pe intermediates headroom
    )
    return int(min(max(1.25 * need, 32 << 20), 64 << 20))


def visual_embedding(feats, pos, params):
    """feats: [B, N, feat_dim] f32, pos: [B, N, 4] f32 -> [B, N, d_model] f32."""
    B, N, F = feats.shape
    D = params["w_feat"].shape[1]
    n_obj = params["obj_table"].shape[0]

    b_tile = _choose_b_tile(B, N)
    rows = b_tile * N
    grid = (B // b_tile,)

    # --- glue (gathers / packing; stays in XLA) ---
    # Default id paths: img_order_ids = zeros(N) -> row 0 of img table;
    # obj_order_ids = arange(N) then flipped: num_embeddings - ids - 1.
    obj_ids = n_obj - 1 - jnp.arange(N, dtype=jnp.int32)
    order_emb = params["img_table"][0][None, :] + params["obj_table"][obj_ids, :]   # [N, D]
    order_tile = jnp.tile(order_emb, (b_tile, 1)).astype(jnp.float32)               # [rows, D]

    pack = jnp.zeros((_PACK_ROWS, D), jnp.float32)
    pack = pack.at[_ROW_W_X1:_ROW_W_AREA + 1].set(params["w_pos"])
    pack = pack.at[_ROW_B_POS].set(params["b_pos"][0])
    pack = pack.at[_ROW_G_POS].set(params["g_pos"][0])
    pack = pack.at[_ROW_BETA_POS].set(params["beta_pos"][0])
    pack = pack.at[_ROW_B_FEAT].set(params["b_feat"][0])
    pack = pack.at[_ROW_G_FEAT].set(params["g_feat"][0])
    pack = pack.at[_ROW_BETA_FEAT].set(params["beta_feat"][0])

    # bf16 operands halve HBM traffic for the two big streams and 2-4x MXU throughput;
    # accumulation and LayerNorm stay f32 inside the kernel.
    feats2 = feats.reshape(B * N, F).astype(jnp.bfloat16)
    pos2 = pos.reshape(B * N, 4).astype(jnp.float32)
    w_feat = params["w_feat"].astype(jnp.bfloat16)

    cost = pl.CostEstimate(
        flops=2 * B * N * F * D + 16 * B * N * D,
        transcendentals=2 * B * N,
        bytes_accessed=(feats2.size * 2 + pos2.size * 4 + w_feat.size * 2
                        + pack.size * 4 + order_tile.size * 4 + B * N * D * 4),
    )
    compiler_params = pltpu.CompilerParams(
        dimension_semantics=("parallel",),
        vmem_limit_bytes=_vmem_limit_bytes(rows, F, D),
    )

    def run(single_buffer_consts):
        def const_spec(shape):
            index_map = lambda b: (0,) * len(shape)
            if single_buffer_consts:
                # Constant-index inputs don't need double buffering -> halve their VMEM.
                return pl.BlockSpec(shape, index_map, pipeline_mode=pl.Buffered(1))
            return pl.BlockSpec(shape, index_map)

        return pl.pallas_call(
            visual_embedding_kernel,
            out_shape=jax.ShapeDtypeStruct((B * N, D), feats.dtype),
            grid=grid,
            in_specs=[
                pl.BlockSpec((rows, F), lambda b: (b, 0)),   # feats rows (bf16)
                pl.BlockSpec((rows, 4), lambda b: (b, 0)),   # pos rows (f32)
                const_spec((F, D)),                          # w_feat (bf16)
                const_spec((_PACK_ROWS, D)),                 # packed small params (f32)
                const_spec((rows, D)),                       # order embeddings, pre-tiled (f32)
            ],
            out_specs=pl.BlockSpec((rows, D), lambda b: (b, 0)),
            compiler_params=compiler_params,
            cost_estimate=cost,
        )(feats2, pos2, w_feat, pack, order_tile)

    try:
        out2 = jax.block_until_ready(run(single_buffer_consts=True))
    except Exception:
        # pl.Buffered(1) unsupported on this jax/libtpu build -> default double buffering.
        out2 = run(single_buffer_consts=False)

    return out2.reshape(B, N, D)


def visual_embedding_reference(feats, pos, params, matmul_dtype=jnp.float32):
    """Pure-JAX reference mirroring the PyTorch forward.

    With matmul_dtype=bf16 it reproduces the kernel's mixed precision (bf16 operands,
    f32 accumulation) for an apples-to-apples comparison."""
    N = feats.shape[1]
    n_obj = params["obj_table"].shape[0]

    fe = jnp.dot(feats.astype(matmul_dtype), params["w_feat"].astype(matmul_dtype),
                 preferred_element_type=jnp.float32, precision=lax.Precision.HIGHEST)
    fe = fe + params["b_feat"]
    fe = _layer_norm(fe, params["g_feat"], params["beta_feat"])

    area = (pos[..., 3] - pos[..., 2]) * (pos[..., 1] - pos[..., 0])
    pos5 = jnp.concatenate([pos, area[..., None]], axis=-1)
    pe = jnp.dot(pos5, params["w_pos"],
                 preferred_element_type=jnp.float32, precision=lax.Precision.HIGHEST)
    pe = pe + params["b_pos"]
    pe = _layer_norm(pe, params["g_pos"], params["beta_pos"])

    img_emb = params["img_table"][jnp.zeros((N,), jnp.int32)]       # [N, D]
    obj_ids = n_obj - 1 - jnp.arange(N, dtype=jnp.int32)
    obj_emb = params["obj_table"][obj_ids]                          # [N, D]

    return fe + pe + img_emb[None] + obj_emb[None]


def make_params(key, feat_dim, pos_dim, d_model, n_images, n_obj_embeddings):
    ks = jax.random.split(key, 6)
    scale = 0.02
    return {
        # Linear(feat_dim, d_model) stored as (in, out)
        "w_feat": scale * jax.random.normal(ks[0], (feat_dim, d_model), jnp.float32),
        "b_feat": scale * jax.random.normal(ks[1], (1, d_model), jnp.float32),
        "g_feat": jnp.ones((1, d_model), jnp.float32),
        "beta_feat": jnp.zeros((1, d_model), jnp.float32),
        # Linear(pos_dim + 1, d_model)
        "w_pos": scale * jax.random.normal(ks[2], (pos_dim + 1, d_model), jnp.float32),
        "b_pos": scale * jax.random.normal(ks[3], (1, d_model), jnp.float32),
        "g_pos": jnp.ones((1, d_model), jnp.float32),
        "beta_pos": jnp.zeros((1, d_model), jnp.float32),
        # nn.Embedding(n_images, d_model) and shared obj_order_embedding
        "img_table": scale * jax.random.normal(ks[4], (n_images, d_model), jnp.float32),
        "obj_table": scale * jax.random.normal(ks[5], (n_obj_embeddings, d_model), jnp.float32),
    }


if __name__ == "__main__":
    key = jax.random.PRNGKey(0)
    B, N = 2, 8
    feat_dim, pos_dim, d_model = 32, 4, 32
    n_images, n_obj_embeddings = 4, 64

    k_feat, k_pos, k_param = jax.random.split(key, 3)
    feats = jax.random.normal(k_feat, (B, N, feat_dim), jnp.float32)
    # pos boxes in [0, 1]: (x1, x2, y1, y2)
    pos = jax.random.uniform(k_pos, (B, N, pos_dim), jnp.float32)

    params = make_params(k_param, feat_dim, pos_dim, d_model, n_images, n_obj_embeddings)

    out = visual_embedding(feats, pos, params)
    out = jax.block_until_ready(out)
    assert out.shape == (B, N, d_model)

    # Apples-to-apples check: reference with the same bf16 matmul operands / f32 accumulation.
    ref_mixed = visual_embedding_reference(feats, pos, params, matmul_dtype=jnp.bfloat16)
    assert jnp.allclose(out, ref_mixed, atol=1e-4, rtol=1e-4), (
        f"kernel mismatch vs mixed-precision reference: {jnp.max(jnp.abs(out - ref_mixed))}")

    # Sanity check vs the full-f32 (PyTorch-equivalent) reference; the only difference is
    # the bf16 rounding of the feat-matmul operands.
    ref_f32 = visual_embedding_reference(feats, pos, params, matmul_dtype=jnp.float32)
    assert jnp.allclose(out, ref_f32, atol=1e-1, rtol=1e-1), (
        f"kernel deviates too far from f32 reference: {jnp.max(jnp.abs(out - ref_f32))}")

    print("KERNEL_OK")
</pallas_src>

<mosaic_0001>
module attributes {stable_mosaic.version = 11 : i64} {
  func.func @visual_embedding_kernel(%arg0: i32, %arg1: memref<16x32xbf16, #tpu.memory_space<vmem>>, %arg2: memref<16x4xf32, #tpu.memory_space<vmem>>, %arg3: memref<32x32xbf16, #tpu.memory_space<vmem>>, %arg4: memref<16x32xf32, #tpu.memory_space<vmem>>, %arg5: memref<16x32xf32, #tpu.memory_space<vmem>>, %arg6: memref<16x32xf32, #tpu.memory_space<vmem>>) attributes {dimension_semantics = [#tpu.dimension_semantics<parallel>], iteration_bounds = array<i64: 1>, scalar_prefetch = 0 : i64, scratch_operands = 0 : i64, tpu.core_type = #tpu.core_type<tc>, window_params = [{transform_indices = @transform_0, window_bounds = array<i64: 16, 32>}, {transform_indices = @transform_1, window_bounds = array<i64: 16, 4>}, {pipeline_mode = #tpu.pipeline_mode<synchronous>, transform_indices = @transform_2, window_bounds = array<i64: 32, 32>}, {pipeline_mode = #tpu.pipeline_mode<synchronous>, transform_indices = @transform_3, window_bounds = array<i64: 16, 32>}, {pipeline_mode = #tpu.pipeline_mode<synchronous>, transform_indices = @transform_4, window_bounds = array<i64: 16, 32>}, {transform_indices = @transform_5, window_bounds = array<i64: 16, 32>}]} {
    %c0 = arith.constant 0 : index
    %c0_0 = arith.constant 0 : index
    %0 = vector.load %arg1[%c0, %c0_0] : memref<16x32xbf16, #tpu.memory_space<vmem>>, vector<16x32xbf16>
    %c0_1 = arith.constant 0 : index
    %c0_2 = arith.constant 0 : index
    %1 = vector.load %arg2[%c0_1, %c0_2] : memref<16x4xf32, #tpu.memory_space<vmem>>, vector<16x4xf32>
    %c0_3 = arith.constant 0 : index
    %c0_4 = arith.constant 0 : index
    %2 = vector.load %arg4[%c0_3, %c0_4] : memref<16x32xf32, #tpu.memory_space<vmem>>, vector<16x32xf32>
    %c0_5 = arith.constant 0 : index
    %c0_6 = arith.constant 0 : index
    %3 = vector.load %arg3[%c0_5, %c0_6] : memref<32x32xbf16, #tpu.memory_space<vmem>>, vector<32x32xbf16>
    %cst = arith.constant dense<0.000000e+00> : vector<16x32xf32>
    %4 = tpu.matmul %0, %3, %cst {dimension_numbers = #tpu.dot_dimension_numbers<[1], [0], [0], [1], [0, 0, 1, 1], [], []>} : vector<16x32xbf16>, vector<32x32xbf16>, vector<16x32xf32> -> vector<16x32xf32>
    %5 = vector.extract_strided_slice %2 {offsets = [8, 0], sizes = [1, 32], strides = [1, 1]} : vector<16x32xf32> to vector<1x32xf32>
    %6 = vector.broadcast %5 : vector<1x32xf32> to vector<16x32xf32>
    %7 = arith.addf %4, %6 : vector<16x32xf32>
    %8 = vector.extract_strided_slice %2 {offsets = [9, 0], sizes = [1, 32], strides = [1, 1]} : vector<16x32xf32> to vector<1x32xf32>
    %9 = vector.extract_strided_slice %2 {offsets = [10, 0], sizes = [1, 32], strides = [1, 1]} : vector<16x32xf32> to vector<1x32xf32>
    %cst_7 = arith.constant dense<0.000000e+00> : vector<16xf32>
    %10 = vector.multi_reduction <add>, %7, %cst_7 [1] : vector<16x32xf32> to vector<16xf32>
    %11 = vector.shape_cast %10 : vector<16xf32> to vector<16x1xf32>
    %cst_8 = arith.constant 3.200000e+01 : f32
    %12 = vector.broadcast %cst_8 : f32 to vector<16x1xf32>
    %13 = arith.divf %11, %12 : vector<16x1xf32>
    %14 = vector.broadcast %13 : vector<16x1xf32> to vector<16x32xf32>
    %15 = arith.subf %7, %14 : vector<16x32xf32>
    %16 = arith.mulf %15, %15 : vector<16x32xf32>
    %cst_9 = arith.constant dense<0.000000e+00> : vector<16xf32>
    %17 = vector.multi_reduction <add>, %16, %cst_9 [1] : vector<16x32xf32> to vector<16xf32>
    %18 = vector.shape_cast %17 : vector<16xf32> to vector<16x1xf32>
    %cst_10 = arith.constant 3.200000e+01 : f32
    %19 = vector.broadcast %cst_10 : f32 to vector<16x1xf32>
    %20 = arith.divf %18, %19 : vector<16x1xf32>
    %cst_11 = arith.constant 9.99999974E-6 : f32
    %21 = vector.broadcast %cst_11 : f32 to vector<16x1xf32>
    %22 = arith.addf %20, %21 : vector<16x1xf32>
    %23 = math.rsqrt %22 : vector<16x1xf32>
    %24 = vector.broadcast %23 : vector<16x1xf32> to vector<16x32xf32>
    %25 = arith.mulf %15, %24 : vector<16x32xf32>
    %26 = vector.broadcast %8 : vector<1x32xf32> to vector<16x32xf32>
    %27 = arith.mulf %25, %26 : vector<16x32xf32>
    %28 = vector.broadcast %9 : vector<1x32xf32> to vector<16x32xf32>
    %29 = arith.addf %27, %28 : vector<16x32xf32>
    %30 = vector.extract_strided_slice %1 {offsets = [0, 0], sizes = [16, 1], strides = [1, 1]} : vector<16x4xf32> to vector<16x1xf32>
    %31 = vector.extract_strided_slice %1 {offsets = [0, 1], sizes = [16, 1], strides = [1, 1]} : vector<16x4xf32> to vector<16x1xf32>
    %32 = vector.extract_strided_slice %1 {offsets = [0, 2], sizes = [16, 1], strides = [1, 1]} : vector<16x4xf32> to vector<16x1xf32>
    %33 = vector.extract_strided_slice %1 {offsets = [0, 3], sizes = [16, 1], strides = [1, 1]} : vector<16x4xf32> to vector<16x1xf32>
    %34 = arith.subf %33, %32 : vector<16x1xf32>
    %35 = arith.subf %31, %30 : vector<16x1xf32>
    %36 = arith.mulf %34, %35 : vector<16x1xf32>
    %37 = vector.extract_strided_slice %2 {offsets = [0, 0], sizes = [1, 32], strides = [1, 1]} : vector<16x32xf32> to vector<1x32xf32>
    %38 = vector.broadcast %30 : vector<16x1xf32> to vector<16x32xf32>
    %39 = vector.broadcast %37 : vector<1x32xf32> to vector<16x32xf32>
    %40 = arith.mulf %38, %39 : vector<16x32xf32>
    %41 = vector.extract_strided_slice %2 {offsets = [1, 0], sizes = [1, 32], strides = [1, 1]} : vector<16x32xf32> to vector<1x32xf32>
    %42 = vector.broadcast %31 : vector<16x1xf32> to vector<16x32xf32>
    %43 = vector.broadcast %41 : vector<1x32xf32> to vector<16x32xf32>
    %44 = arith.mulf %42, %43 : vector<16x32xf32>
    %45 = arith.addf %40, %44 : vector<16x32xf32>
    %46 = vector.extract_strided_slice %2 {offsets = [2, 0], sizes = [1, 32], strides = [1, 1]} : vector<16x32xf32> to vector<1x32xf32>
    %47 = vector.broadcast %32 : vector<16x1xf32> to vector<16x32xf32>
    %48 = vector.broadcast %46 : vector<1x32xf32> to vector<16x32xf32>
    %49 = arith.mulf %47, %48 : vector<16x32xf32>
    %50 = arith.addf %45, %49 : vector<16x32xf32>
    %51 = vector.extract_strided_slice %2 {offsets = [3, 0], sizes = [1, 32], strides = [1, 1]} : vector<16x32xf32> to vector<1x32xf32>
    %52 = vector.broadcast %33 : vector<16x1xf32> to vector<16x32xf32>
    %53 = vector.broadcast %51 : vector<1x32xf32> to vector<16x32xf32>
    %54 = arith.mulf %52, %53 : vector<16x32xf32>
    %55 = arith.addf %50, %54 : vector<16x32xf32>
    %56 = vector.extract_strided_slice %2 {offsets = [4, 0], sizes = [1, 32], strides = [1, 1]} : vector<16x32xf32> to vector<1x32xf32>
    %57 = vector.broadcast %36 : vector<16x1xf32> to vector<16x32xf32>
    %58 = vector.broadcast %56 : vector<1x32xf32> to vector<16x32xf32>
    %59 = arith.mulf %57, %58 : vector<16x32xf32>
    %60 = arith.addf %55, %59 : vector<16x32xf32>
    %61 = vector.extract_strided_slice %2 {offsets = [5, 0], sizes = [1, 32], strides = [1, 1]} : vector<16x32xf32> to vector<1x32xf32>
    %62 = vector.broadcast %61 : vector<1x32xf32> to vector<16x32xf32>
    %63 = arith.addf %60, %62 : vector<16x32xf32>
    %64 = vector.extract_strided_slice %2 {offsets = [6, 0], sizes = [1, 32], strides = [1, 1]} : vector<16x32xf32> to vector<1x32xf32>
    %65 = vector.extract_strided_slice %2 {offsets = [7, 0], sizes = [1, 32], strides = [1, 1]} : vector<16x32xf32> to vector<1x32xf32>
    %cst_12 = arith.constant dense<0.000000e+00> : vector<16xf32>
    %66 = vector.multi_reduction <add>, %63, %cst_12 [1] : vector<16x32xf32> to vector<16xf32>
    %67 = vector.shape_cast %66 : vector<16xf32> to vector<16x1xf32>
    %cst_13 = arith.constant 3.200000e+01 : f32
    %68 = vector.broadcast %cst_13 : f32 to vector<16x1xf32>
    %69 = arith.divf %67, %68 : vector<16x1xf32>
    %70 = vector.broadcast %69 : vector<16x1xf32> to vector<16x32xf32>
    %71 = arith.subf %63, %70 : vector<16x32xf32>
    %72 = arith.mulf %71, %71 : vector<16x32xf32>
    %cst_14 = arith.constant dense<0.000000e+00> : vector<16xf32>
    %73 = vector.multi_reduction <add>, %72, %cst_14 [1] : vector<16x32xf32> to vector<16xf32>
    %74 = vector.shape_cast %73 : vector<16xf32> to vector<16x1xf32>
    %cst_15 = arith.constant 3.200000e+01 : f32
    %75 = vector.broadcast %cst_15 : f32 to vector<16x1xf32>
    %76 = arith.divf %74, %75 : vector<16x1xf32>
    %cst_16 = arith.constant 9.99999974E-6 : f32
    %77 = vector.broadcast %cst_16 : f32 to vector<16x1xf32>
    %78 = arith.addf %76, %77 : vector<16x1xf32>
    %79 = math.rsqrt %78 : vector<16x1xf32>
    %80 = vector.broadcast %79 : vector<16x1xf32> to vector<16x32xf32>
    %81 = arith.mulf %71, %80 : vector<16x32xf32>
    %82 = vector.broadcast %64 : vector<1x32xf32> to vector<16x32xf32>
    %83 = arith.mulf %81, %82 : vector<16x32xf32>
    %84 = vector.broadcast %65 : vector<1x32xf32> to vector<16x32xf32>
    %85 = arith.addf %83, %84 : vector<16x32xf32>
    %86 = arith.addf %29, %85 : vector<16x32xf32>
    %c0_17 = arith.constant 0 : index
    %c0_18 = arith.constant 0 : index
    %87 = vector.load %arg5[%c0_17, %c0_18] : memref<16x32xf32, #tpu.memory_space<vmem>>, vector<16x32xf32>
    %88 = arith.addf %86, %87 : vector<16x32xf32>
    %c0_19 = arith.constant 0 : index
    %c0_20 = arith.constant 0 : index
    %89 = vector.load %arg6[%c0_19, %c0_20] : memref<16x32xf32, #tpu.memory_space<vmem>>, vector<16x32xf32>
    tpu.vector_store %arg6[%c0_19, %c0_20], %88 {strides = array<i32>} : memref<16x32xf32, #tpu.memory_space<vmem>>, vector<16x32xf32>,
    return
  }
  func.func @transform_0(%arg0: i32) -> (i32, i32) {
    %c0_i32 = arith.constant 0 : i32
    %c0_i32_0 = arith.constant 0 : i32
    return %arg0, %c0_i32 : i32, i32
  }
  func.func @transform_1(%arg0: i32) -> (i32, i32) {
    %c0_i32 = arith.constant 0 : i32
    %c0_i32_0 = arith.constant 0 : i32
    return %arg0, %c0_i32 : i32, i32
  }
  func.func @transform_2(%arg0: i32) -> (i32, i32) {
    %c0_i32 = arith.constant 0 : i32
    %c0_i32_0 = arith.constant 0 : i32
    %c0_i32_1 = arith.constant 0 : i32
    return %c0_i32, %c0_i32_0 : i32, i32
  }
  func.func @transform_3(%arg0: i32) -> (i32, i32) {
    %c0_i32 = arith.constant 0 : i32
    %c0_i32_0 = arith.constant 0 : i32
    %c0_i32_1 = arith.constant 0 : i32
    return %c0_i32, %c0_i32_0 : i32, i32
  }
  func.func @transform_4(%arg0: i32) -> (i32, i32) {
    %c0_i32 = arith.constant 0 : i32
    %c0_i32_0 = arith.constant 0 : i32
    %c0_i32_1 = arith.constant 0 : i32
    return %c0_i32, %c0_i32_0 : i32, i32
  }
  func.func @transform_5(%arg0: i32) -> (i32, i32) {
    %c0_i32 = arith.constant 0 : i32
    %c0_i32_0 = arith.constant 0 : i32
    return %arg0, %c0_i32 : i32, i32
  }
}

module attributes {stable_mosaic.version = 11 : i64} {
  func.func @visual_embedding_kernel(%arg0: i32, %arg1: memref<16x32xbf16, #tpu.memory_space<vmem>>, %arg2: memref<16x4xf32, #tpu.memory_space<vmem>>, %arg3: memref<32x32xbf16, #tpu.memory_space<vmem>>, %arg4: memref<16x32xf32, #tpu.memory_space<vmem>>, %arg5: memref<16x32xf32, #tpu.memory_space<vmem>>, %arg6: memref<16x32xf32, #tpu.memory_space<vmem>>) attributes {dimension_semantics = [#tpu.dimension_semantics<parallel>], iteration_bounds = array<i64: 1>, scalar_prefetch = 0 : i64, scratch_operands = 0 : i64, tpu.core_type = #tpu.core_type<tc>, window_params = [{transform_indices = @transform_0, window_bounds = array<i64: 16, 32>}, {transform_indices = @transform_1, window_bounds = array<i64: 16, 4>}, {pipeline_mode = #tpu.pipeline_mode<synchronous>, transform_indices = @transform_2, window_bounds = array<i64: 32, 32>}, {pipeline_mode = #tpu.pipeline_mode<synchronous>, transform_indices = @transform_3, window_bounds = array<i64: 16, 32>}, {pipeline_mode = #tpu.pipeline_mode<synchronous>, transform_indices = @transform_4, window_bounds = array<i64: 16, 32>}, {transform_indices = @transform_5, window_bounds = array<i64: 16, 32>}]} {
    %c0 = arith.constant 0 : index
    %c0_0 = arith.constant 0 : index
    %0 = vector.load %arg1[%c0, %c0_0] : memref<16x32xbf16, #tpu.memory_space<vmem>>, vector<16x32xbf16>
    %c0_1 = arith.constant 0 : index
    %c0_2 = arith.constant 0 : index
    %1 = vector.load %arg2[%c0_1, %c0_2] : memref<16x4xf32, #tpu.memory_space<vmem>>, vector<16x4xf32>
    %c0_3 = arith.constant 0 : index
    %c0_4 = arith.constant 0 : index
    %2 = vector.load %arg4[%c0_3, %c0_4] : memref<16x32xf32, #tpu.memory_space<vmem>>, vector<16x32xf32>
    %c0_5 = arith.constant 0 : index
    %c0_6 = arith.constant 0 : index
    %3 = vector.load %arg3[%c0_5, %c0_6] : memref<32x32xbf16, #tpu.memory_space<vmem>>, vector<32x32xbf16>
    %cst = arith.constant dense<0.000000e+00> : vector<16x32xf32>
    %4 = tpu.matmul %0, %3, %cst {dimension_numbers = #tpu.dot_dimension_numbers<[1], [0], [0], [1], [0, 0, 1, 1], [], []>} : vector<16x32xbf16>, vector<32x32xbf16>, vector<16x32xf32> -> vector<16x32xf32>
    %5 = vector.extract_strided_slice %2 {offsets = [8, 0], sizes = [1, 32], strides = [1, 1]} : vector<16x32xf32> to vector<1x32xf32>
    %6 = vector.broadcast %5 : vector<1x32xf32> to vector<16x32xf32>
    %7 = arith.addf %4, %6 : vector<16x32xf32>
    %8 = vector.extract_strided_slice %2 {offsets = [9, 0], sizes = [1, 32], strides = [1, 1]} : vector<16x32xf32> to vector<1x32xf32>
    %9 = vector.extract_strided_slice %2 {offsets = [10, 0], sizes = [1, 32], strides = [1, 1]} : vector<16x32xf32> to vector<1x32xf32>
    %cst_7 = arith.constant dense<0.000000e+00> : vector<16xf32>
    %10 = vector.multi_reduction <add>, %7, %cst_7 [1] : vector<16x32xf32> to vector<16xf32>
    %11 = vector.shape_cast %10 : vector<16xf32> to vector<16x1xf32>
    %cst_8 = arith.constant 3.200000e+01 : f32
    %12 = vector.broadcast %cst_8 : f32 to vector<16x1xf32>
    %13 = arith.divf %11, %12 : vector<16x1xf32>
    %14 = vector.broadcast %13 : vector<16x1xf32> to vector<16x32xf32>
    %15 = arith.subf %7, %14 : vector<16x32xf32>
    %16 = arith.mulf %15, %15 : vector<16x32xf32>
    %cst_9 = arith.constant dense<0.000000e+00> : vector<16xf32>
    %17 = vector.multi_reduction <add>, %16, %cst_9 [1] : vector<16x32xf32> to vector<16xf32>
    %18 = vector.shape_cast %17 : vector<16xf32> to vector<16x1xf32>
    %cst_10 = arith.constant 3.200000e+01 : f32
    %19 = vector.broadcast %cst_10 : f32 to vector<16x1xf32>
    %20 = arith.divf %18, %19 : vector<16x1xf32>
    %cst_11 = arith.constant 9.99999974E-6 : f32
    %21 = vector.broadcast %cst_11 : f32 to vector<16x1xf32>
    %22 = arith.addf %20, %21 : vector<16x1xf32>
    %23 = math.rsqrt %22 : vector<16x1xf32>
    %24 = vector.broadcast %23 : vector<16x1xf32> to vector<16x32xf32>
    %25 = arith.mulf %15, %24 : vector<16x32xf32>
    %26 = vector.broadcast %8 : vector<1x32xf32> to vector<16x32xf32>
    %27 = arith.mulf %25, %26 : vector<16x32xf32>
    %28 = vector.broadcast %9 : vector<1x32xf32> to vector<16x32xf32>
    %29 = arith.addf %27, %28 : vector<16x32xf32>
    %30 = vector.extract_strided_slice %1 {offsets = [0, 0], sizes = [16, 1], strides = [1, 1]} : vector<16x4xf32> to vector<16x1xf32>
    %31 = vector.extract_strided_slice %1 {offsets = [0, 1], sizes = [16, 1], strides = [1, 1]} : vector<16x4xf32> to vector<16x1xf32>
    %32 = vector.extract_strided_slice %1 {offsets = [0, 2], sizes = [16, 1], strides = [1, 1]} : vector<16x4xf32> to vector<16x1xf32>
    %33 = vector.extract_strided_slice %1 {offsets = [0, 3], sizes = [16, 1], strides = [1, 1]} : vector<16x4xf32> to vector<16x1xf32>
    %34 = arith.subf %33, %32 : vector<16x1xf32>
    %35 = arith.subf %31, %30 : vector<16x1xf32>
    %36 = arith.mulf %34, %35 : vector<16x1xf32>
    %37 = vector.extract_strided_slice %2 {offsets = [0, 0], sizes = [1, 32], strides = [1, 1]} : vector<16x32xf32> to vector<1x32xf32>
    %38 = vector.broadcast %30 : vector<16x1xf32> to vector<16x32xf32>
    %39 = vector.broadcast %37 : vector<1x32xf32> to vector<16x32xf32>
    %40 = arith.mulf %38, %39 : vector<16x32xf32>
    %41 = vector.extract_strided_slice %2 {offsets = [1, 0], sizes = [1, 32], strides = [1, 1]} : vector<16x32xf32> to vector<1x32xf32>
    %42 = vector.broadcast %31 : vector<16x1xf32> to vector<16x32xf32>
    %43 = vector.broadcast %41 : vector<1x32xf32> to vector<16x32xf32>
    %44 = arith.mulf %42, %43 : vector<16x32xf32>
    %45 = arith.addf %40, %44 : vector<16x32xf32>
    %46 = vector.extract_strided_slice %2 {offsets = [2, 0], sizes = [1, 32], strides = [1, 1]} : vector<16x32xf32> to vector<1x32xf32>
    %47 = vector.broadcast %32 : vector<16x1xf32> to vector<16x32xf32>
    %48 = vector.broadcast %46 : vector<1x32xf32> to vector<16x32xf32>
    %49 = arith.mulf %47, %48 : vector<16x32xf32>
    %50 = arith.addf %45, %49 : vector<16x32xf32>
    %51 = vector.extract_strided_slice %2 {offsets = [3, 0], sizes = [1, 32], strides = [1, 1]} : vector<16x32xf32> to vector<1x32xf32>
    %52 = vector.broadcast %33 : vector<16x1xf32> to vector<16x32xf32>
    %53 = vector.broadcast %51 : vector<1x32xf32> to vector<16x32xf32>
    %54 = arith.mulf %52, %53 : vector<16x32xf32>
    %55 = arith.addf %50, %54 : vector<16x32xf32>
    %56 = vector.extract_strided_slice %2 {offsets = [4, 0], sizes = [1, 32], strides = [1, 1]} : vector<16x32xf32> to vector<1x32xf32>
    %57 = vector.broadcast %36 : vector<16x1xf32> to vector<16x32xf32>
    %58 = vector.broadcast %56 : vector<1x32xf32> to vector<16x32xf32>
    %59 = arith.mulf %57, %58 : vector<16x32xf32>
    %60 = arith.addf %55, %59 : vector<16x32xf32>
    %61 = vector.extract_strided_slice %2 {offsets = [5, 0], sizes = [1, 32], strides = [1, 1]} : vector<16x32xf32> to vector<1x32xf32>
    %62 = vector.broadcast %61 : vector<1x32xf32> to vector<16x32xf32>
    %63 = arith.addf %60, %62 : vector<16x32xf32>
    %64 = vector.extract_strided_slice %2 {offsets = [6, 0], sizes = [1, 32], strides = [1, 1]} : vector<16x32xf32> to vector<1x32xf32>
    %65 = vector.extract_strided_slice %2 {offsets = [7, 0], sizes = [1, 32], strides = [1, 1]} : vector<16x32xf32> to vector<1x32xf32>
    %cst_12 = arith.constant dense<0.000000e+00> : vector<16xf32>
    %66 = vector.multi_reduction <add>, %63, %cst_12 [1] : vector<16x32xf32> to vector<16xf32>
    %67 = vector.shape_cast %66 : vector<16xf32> to vector<16x1xf32>
    %cst_13 = arith.constant 3.200000e+01 : f32
    %68 = vector.broadcast %cst_13 : f32 to vector<16x1xf32>
    %69 = arith.divf %67, %68 : vector<16x1xf32>
    %70 = vector.broadcast %69 : vector<16x1xf32> to vector<16x32xf32>
    %71 = arith.subf %63, %70 : vector<16x32xf32>
    %72 = arith.mulf %71, %71 : vector<16x32xf32>
    %cst_14 = arith.constant dense<0.000000e+00> : vector<16xf32>
    %73 = vector.multi_reduction <add>, %72, %cst_14 [1] : vector<16x32xf32> to vector<16xf32>
    %74 = vector.shape_cast %73 : vector<16xf32> to vector<16x1xf32>
    %cst_15 = arith.constant 3.200000e+01 : f32
    %75 = vector.broadcast %cst_15 : f32 to vector<16x1xf32>
    %76 = arith.divf %74, %75 : vector<16x1xf32>
    %cst_16 = arith.constant 9.99999974E-6 : f32
    %77 = vector.broadcast %cst_16 : f32 to vector<16x1xf32>
    %78 = arith.addf %76, %77 : vector<16x1xf32>
    %79 = math.rsqrt %78 : vector<16x1xf32>
    %80 = vector.broadcast %79 : vector<16x1xf32> to vector<16x32xf32>
    %81 = arith.mulf %71, %80 : vector<16x32xf32>
    %82 = vector.broadcast %64 : vector<1x32xf32> to vector<16x32xf32>
    %83 = arith.mulf %81, %82 : vector<16x32xf32>
    %84 = vector.broadcast %65 : vector<1x32xf32> to vector<16x32xf32>
    %85 = arith.addf %83, %84 : vector<16x32xf32>
    %86 = arith.addf %29, %85 : vector<16x32xf32>
    %c0_17 = arith.constant 0 : index
    %c0_18 = arith.constant 0 : index
    %87 = vector.load %arg5[%c0_17, %c0_18] : memref<16x32xf32, #tpu.memory_space<vmem>>, vector<16x32xf32>
    %88 = arith.addf %86, %87 : vector<16x32xf32>
    %c0_19 = arith.constant 0 : index
    %c0_20 = arith.constant 0 : index
    %89 = vector.load %arg6[%c0_19, %c0_20] : memref<16x32xf32, #tpu.memory_space<vmem>>, vector<16x32xf32>
    tpu.vector_store %arg6[%c0_19, %c0_20], %88 {strides = array<i32>} : memref<16x32xf32, #tpu.memory_space<vmem>>, vector<16x32xf32>,
    return
  }
  func.func @transform_0(%arg0: i32) -> (i32, i32) {
    %c0_i32 = arith.constant 0 : i32
    %c0_i32_0 = arith.constant 0 : i32
    return %arg0, %c0_i32 : i32, i32
  }
  func.func @transform_1(%arg0: i32) -> (i32, i32) {
    %c0_i32 = arith.constant 0 : i32
    %c0_i32_0 = arith.constant 0 : i32
    return %arg0, %c0_i32 : i32, i32
  }
  func.func @transform_2(%arg0: i32) -> (i32, i32) {
    %c0_i32 = arith.constant 0 : i32
    %c0_i32_0 = arith.constant 0 : i32
    %c0_i32_1 = arith.constant 0 : i32
    return %c0_i32, %c0_i32_0 : i32, i32
  }
  func.func @transform_3(%arg0: i32) -> (i32, i32) {
    %c0_i32 = arith.constant 0 : i32
    %c0_i32_0 = arith.constant 0 : i32
    %c0_i32_1 = arith.constant 0 : i32
    return %c0_i32, %c0_i32_0 : i32, i32
  }
  func.func @transform_4(%arg0: i32) -> (i32, i32) {
    %c0_i32 = arith.constant 0 : i32
    %c0_i32_0 = arith.constant 0 : i32
    %c0_i32_1 = arith.constant 0 : i32
    return %c0_i32, %c0_i32_0 : i32, i32
  }
  func.func @transform_5(%arg0: i32) -> (i32, i32) {
    %c0_i32 = arith.constant 0 : i32
    %c0_i32_0 = arith.constant 0 : i32
    return %arg0, %c0_i32 : i32, i32
  }
}

</mosaic_0001>

<bundles_post_ra>
// kernel: tpu_custom_call.1
= control target key start
LH: loop header
LB: loop body
LE: loop exit
PB: predicated region body
PF: predicated region fallthrough
CT: control target
= control target key end

     0   :  { %10 = vsyncpa [#allocation3], 0  ;;  %s601_s0 = inlined_call_operand.hbm [shape: bf16[16,32], index: 0, kind: input, shape index: {}]   ;;  %s602_s1 = inlined_call_operand.vmem [shape: f32[16,4], index: 1, kind: input, shape index: {}]   ;;  %s603_s2 = inlined_call_operand.vmem [shape: bf16[32,32], index: 2, kind: input, shape index: {}]   ;;  %s604_s3 = inlined_call_operand.hbm [shape: f32[16,32], index: 3, kind: input, shape index: {}]   ;;  %s605_s4 = inlined_call_operand.hbm [shape: f32[16,32], index: 4, kind: input, shape index: {}]   ;;  %s606_s5 = inlined_call_operand.hbm [shape: f32[16,32], index: 5, kind: output, shape index: {}]  }
   0x1   :  { %11 = vsyncpa [#allocation6], 0 }
   0x2   :  { %12 = vsyncpa [#allocation4], 0  ;;  %s483_s18 = smov [#allocation5]  }
   0x3   :  { %s34_s19 = sshll.u32 %s483_s18, 4  ;;  %s35_s19 = int_to_ptr.vmem [resolvable:$true] %s34_s19 }
   0x4   :  { %s405_s20 = scalar_lea.vmem %s35_s19, 256  ;;  %p410_p1 = scmp.lt.s32.totalorder %s35_s19, %s35_s19 }
   0x5   :  { %p406_p0 = scmp.ne.s32.totalorder %s35_s19, %s405_s20  ;;  %p411_p2 = scmp.lt.s32.totalorder %s405_s20, %s405_s20 }
   0x7   :  { %p412_p3 = por %p411_p2, %p410_p1 }
   0x9   :  { %p413_p4 = pnand %p412_p3, %p406_p0 }
   0xb   :  { %416 = shalt.err (!%p413_p4)
}
   0xc   :  { %s484_s21 = smov 128   ;;  %s485_s22 = smov 8  }
   0xd   :  { %40 = dma.hbm_to_vmem [thread:$0]  %s604_s3, 256, %s35_s19, [#allocation6], %s484_s21, %s484_s21, %s485_s22  }
   0xe   :  { %s486_s25 = smov [#allocation2]  }
   0xf   :  { %s18_s26 = sshll.u32 %s486_s25, 4  ;;  %s19_s26 = int_to_ptr.vmem [resolvable:$true] %s18_s26 }
  0x10   :  { %s425_s27 = scalar_lea.vmem %s19_s26, 128  ;;  %p430_p6 = scmp.lt.s32.totalorder %s19_s26, %s19_s26 }
  0x11   :  { %p426_p5 = scmp.ne.s32.totalorder %s19_s26, %s425_s27  ;;  %p431_p7 = scmp.lt.s32.totalorder %s425_s27, %s425_s27 }
  0x13   :  { %p432_p8 = por %p431_p7, %p430_p6 }
  0x15   :  { %p433_p9 = pnand %p432_p8, %p426_p5 }
  0x17   :  { %436 = shalt.err (!%p433_p9)
}
  0x18   :  { %s487_s28 = smov 64   ;;  %s488_s29 = smov 4  }
  0x19   :  { %24 = dma.hbm_to_vmem [thread:$0]  %s601_s0, 128, %s19_s26, [#allocation3], %s487_s28, %s487_s28, %s488_s29  }
  0x1a   :  { %s489_s7 = smov [#allocation7]  }
  0x1b   :  { %s46_s8 = sshll.u32 %s489_s7, 4  ;;  %s47_s8 = int_to_ptr.vmem [resolvable:$true] %s46_s8 }
  0x1c   :  { %s445_s3 = scalar_lea.vmem %s47_s8, 256  ;;  %p450_p11 = scmp.lt.s32.totalorder %s47_s8, %s47_s8 }
  0x1d   :  { %p446_p10 = scmp.ne.s32.totalorder %s47_s8, %s445_s3  ;;  %p451_p12 = scmp.lt.s32.totalorder %s445_s3, %s445_s3 }
  0x1f   :  { %p452_p13 = por %p451_p12, %p450_p11 }
  0x21   :  { %p453_p0 = pnand %p452_p13, %p446_p10 }
  0x23   :  { %456 = shalt.err (!%p453_p0)
}
  0x24   :  { %52 = dma.hbm_to_vmem [thread:$0]  %s605_s4, 256, %s47_s8, [#allocation6], %s484_s21, %s484_s21, %s485_s22  }
  0x25   :  { %477 = dma.done.wait [#allocation3], 128  }
  0x26   :  { %478 = vsyncadd [#allocation3], 4294967168 }
  0x27   :  { %479 = dma.done.wait [#allocation6], 512  }
  0x28   :  { %480 = vsyncadd [#allocation6], 4294966784  ;;  %v490_v0 = vmov 0.0   ;;  %vm491_vm0 = vmmov 0   ;;  %v492_v1 = vmov 0   ;;  %v65_v2 = vld [vmem:[%s602_s1] sm:$0xff]  ;;  %v73_v14 = vlaneseq }
  0x29   :  { %355 = vmatprep.subr.bf16.mxu0 %v490_v0  ;;  %359 = vmatprep.mubr.msk.bf16.mxu0 %vm491_vm0, %v490_v0  ;;  %s493_s12 = smov 1   ;;  %v386_v3 = vld [vmem:[%s603_s2 + $0x8] sm:$0xff]   ;;  %v387_v5 = vld [vmem:[%s603_s2] sm:$0xff]   ;;  %vm94_vm1 = vcmask 261120   ;;  %v494_v7 = vmov 1   ;;  %v495_v8 = vmov 3  }
  0x2a   :  { %380 = vset.pattern.permute.xlu1 %v492_v1  ;;  %379 = vset.pattern.permute.xlu0 %v492_v1  ;;  %v66_v4 = vld [vmem:[%s602_s1 + $0x8] sm:$0xff]  ;;  %v388_v6 = vld [vmem:[#allocation2] sm:$0xff]   ;;  %s496_s1 = smov 2   ;;  %v497_v13 = vmov 2   ;;  %v557_v15 = vshrl.u32 %v73_v14, 7  ;;  %v68_v18 = vld [vmem:[#allocation5 + $0x8] sm:$0xff] }
  0x2b   :  { %180 = vrot.lane.b32.xlu0 %v65_v2, %s493_s12  ;;  %356 = vmatpush3.bf16.msra.mxu0 %v386_v3  ;;  %v568_v37 = vld [vmem:[#allocation5] sm:$0xff]  ;;  %s498_s2 = smov [#allocation8]  }
  0x2c   :  { %357 = vmatprep.subr.bf16.mxu0 %v490_v0  ;;  %v168_v16 = vsub.s32 1, %v557_v15  ;;  %v174_v17 = vsub.s32 2, %v557_v15  ;;  %v75_v29 = vsub.s32 0, %v557_v15  ;;  %v254_v47 = vsub.s32 3, %v557_v15  ;;  %s335_s18 = sshll.u32 %s498_s2, 4  ;;  %s336_s18 = int_to_ptr.vmem [resolvable:$true] %s335_s18 }
  0x2d   :  { %v272_v48 = vsub.s32 4, %v557_v15  ;;  %v280_v57 = vsub.s32 5, %v557_v15  ;;  %s457_s19 = scalar_lea.vmem %s336_s18, 256  ;;  %p462_p2 = scmp.lt.s32.totalorder %s336_s18, %s336_s18 }
  0x2e   :  { %v561_v19 = vrot.slane %v68_v18, %v168_v16  ;;  %v563_v20 = vrot.slane %v68_v18, %v174_v17  ;;  %v76_v30 = vrot.slane %v68_v18, %v75_v29  ;;  %v209_v40 = vrot.slane %v568_v37, %v75_v29  ;;  %p458_p1 = scmp.ne.s32.totalorder %s336_s18, %s457_s19  ;;  %p463_p3 = scmp.lt.s32.totalorder %s457_s19, %s457_s19 }
  0x2f   :  { %182 = vrot.lane.b32.xlu0 %v66_v4, %s493_s12  ;;  %358 = vmatpush3.bf16.msra.mxu0 %v387_v5  ;;  %v223_v41 = vrot.slane %v568_v37, %v168_v16  ;;  %v239_v46 = vrot.slane %v568_v37, %v174_v17  ;;  %v255_v54 = vrot.slane %v568_v37, %v254_v47 }
  0x30   :  { %v273_v56 = vrot.slane %v568_v37, %v272_v48  ;;  %v281_v63 = vrot.slane %v568_v37, %v280_v57  ;;  %v312_v57 = vsub.s32 6, %v557_v15  ;;  %p464_p4 = por %p463_p3, %p462_p2 }
  0x32   :  { %360 = vmatmul.mubr.msk.bf16.vlgmr.msra.gmra.mxu0 %vm94_vm1, %v388_v6  ;;  %p465_p5 = pnand %p464_p4, %p458_p1 }
  0x33   :  { %199 = vperm.xlu0 %379, %v65_v2  }
  0x37   :  { %382 = vset.pattern.permute.xlu0 %v494_v7 }
  0x38   :  { %217 = vperm.xlu0 %382, %v66_v4  }
  0x3c   :  { %384 = vset.pattern.permute.xlu0 %v495_v8 }
  0x3d   :  { %245 = vperm.xlu0 %384, %v65_v2  }
  0x9d   :  { %v181_v9 = vpop.permute.xlu0 %180 }
  0x9e   :  { %v186_v10 = vsub.f32 %v65_v2, %v181_v9 }
  0xa0   :  { %190 = vrot.lane.b32.xlu1 %v186_v10, %s496_s1 }
  0xa1   :  { %v183_v11 = vpop.permute.xlu0 %182 }
  0xa2   :  { %v187_v12 = vsub.f32 %v66_v4, %v183_v11 }
  0xa4   :  { %192 = vrot.lane.b32.xlu1 %v187_v12, %s496_s1 }
  0xa8   :  { %203 = vperm.xlu1 %380, %v66_v4  }
  0xac   :  { %381 = vset.pattern.permute.xlu1 %v494_v7 }
  0xad   :  { %213 = vperm.xlu1 %381, %v65_v2  }
  0xae   :  { %v200_v39 = vpop.permute.xlu0 %199 }
  0xaf   :  { %v210_v43 = vmul.f32 %v209_v40, %v200_v39 }
  0xb1   :  { %383 = vset.pattern.permute.xlu1 %v497_v13 }
  0xb2   :  { %229 = vperm.xlu1 %383, %v65_v2  }
  0xb3   :  { %v218_v45 = vpop.permute.xlu0 %217 }
  0xb4   :  { %v225_v52 = vmul.f32 %v223_v41, %v218_v45 }
  0xb6   :  { %233 = vperm.xlu1 %383, %v66_v4  }
  0xb8   :  { %v246_v53 = vpop.permute.xlu0 %245 }
  0xb9   :  { %v256_v61 = vmul.f32 %v255_v54, %v246_v53 }
  0xba   :  { %385 = vset.pattern.permute.xlu1 %v495_v8 }
  0xbb   :  { %249 = vperm.xlu1 %385, %v66_v4  }
  0xf2   :  { %v132_v21 = vpop.f32.mrf.mxu0 }
  0xf3   :  { %v133_v32 = vadd.f32 %v132_v21, %v76_v30 }
  0xf4   :  { %v361_v22 = vpop.f32.mrf.mxu0 }
  0xf5   :  { %v139_v34 = vsel %vm94_vm1, %v133_v32, 0.0 }
  0xf6   :  { %v135_v23 = vpop.f32.mrf.mxu0 }
  0xf7   :  { %v136_v31 = vadd.f32 %v135_v23, %v76_v30 }
  0xf8   :  { %v362_v24 = vpop.f32.mrf.mxu0 }
  0xf9   :  { %v142_v33 = vsel %vm94_vm1, %v136_v31, 0.0 }
 0x112   :  { %v191_v25 = vpop.permute.xlu1 %190 }
 0x113   :  { %v196_v26 = vmul.f32 %v191_v25, %v186_v10 }
 0x115   :  { %262 = vperm.xlu1 %385, %v196_v26  }
 0x116   :  { %v193_v27 = vpop.permute.xlu1 %192 }
 0x117   :  { %v197_v28 = vmul.f32 %v193_v27, %v187_v12 }
 0x119   :  { %267 = vperm.xlu0 %384, %v197_v28  }
 0x123   :  { %v204_v35 = vpop.permute.xlu1 %203 }
 0x124   :  { %v211_v49 = vmul.f32 %v209_v40, %v204_v35 }
 0x126   :  { %v227_v59 = vadd.f32 %v225_v52, %v211_v49 }
 0x128   :  { %v214_v36 = vpop.permute.xlu1 %213 }
 0x129   :  { %v224_v42 = vmul.f32 %v223_v41, %v214_v36 }
 0x12b   :  { %v226_v51 = vadd.f32 %v224_v42, %v210_v43 }
 0x12d   :  { %v230_v38 = vpop.permute.xlu1 %229 }
 0x12e   :  { %v240_v50 = vmul.f32 %v239_v46, %v230_v38 }
 0x130   :  { %v242_v60 = vadd.f32 %v240_v50, %v226_v51 }
 0x131   :  { %v234_v44 = vpop.permute.xlu1 %233 }
 0x132   :  { %v241_v58 = vmul.f32 %v239_v46, %v234_v44  ;;  %v258_v2 = vadd.f32 %v256_v61, %v242_v60 }
 0x134   :  { %v243_v0 = vadd.f32 %v241_v58, %v227_v59  ;;  %v318_v58 = vsub.s32 7, %v557_v15  ;;  %v313_v59 = vrot.slane %v568_v37, %v312_v57 }
 0x136   :  { %v250_v55 = vpop.permute.xlu1 %249  ;;  %v319_v61 = vrot.slane %v568_v37, %v318_v58 }
 0x137   :  { %v257_v1 = vmul.f32 %v255_v54, %v250_v55 }
 0x138   :  { %143 = vadd.xlane.f32.xlu0 %v142_v33 }
 0x139   :  { %140 = vadd.xlane.f32.xlu1 %v139_v34  ;;  %v259_v6 = vadd.f32 %v257_v1, %v243_v0  ;;  %v324_v1 = vld [vmem:[#allocation7] sm:$0xff] }
 0x190   :  { %v263_v62 = vpop.permute.xlu1 %262 }
 0x191   :  { %v274_v3 = vmul.f32 %v273_v56, %v263_v62 }
 0x193   :  { %v276_v4 = vadd.f32 %v274_v3, %v258_v2 }
 0x194   :  { %v268_v5 = vpop.permute.xlu0 %267 }
 0x195   :  { %v275_v7 = vmul.f32 %v273_v56, %v268_v5  ;;  %v282_v8 = vadd.f32 %v281_v63, %v276_v4 }
 0x197   :  { %v277_v9 = vadd.f32 %v275_v7, %v259_v6  ;;  %v284_v10 = vsel %vm94_vm1, %v282_v8, 0.0  ;;  %v325_v6 = vld [vmem:[#allocation7 + $0x8] sm:$0xff] }
 0x198   :  { %285 = vadd.xlane.f32.xlu0 %v284_v10 }
 0x199   :  { %v283_v11 = vadd.f32 %v281_v63, %v277_v9 }
 0x19b   :  { %v287_v12 = vsel %vm94_vm1, %v283_v11, 0.0 }
 0x19c   :  { %288 = vadd.xlane.f32.xlu1 %v287_v12 }
 0x1c1   :  { %v144_v13 = vpop.xlane.xlu0 %143 }
 0x1c2   :  { %v147_v14 = vmul.f32 0.03125, %v144_v13  ;;  %v141_v16 = vpop.xlane.xlu1 %140 }
 0x1c3   :  { %v146_v17 = vmul.f32 0.03125, %v141_v16 }
 0x1c4   :  { %v149_v18 = vsub.f32 %v136_v31, %v147_v14 }
 0x1c5   :  { %v148_v21 = vsub.f32 %v133_v32, %v146_v17 }
 0x1c6   :  { %v151_v22 = vmul.f32 %v149_v18, %v149_v18 }
 0x1c7   :  { %v150_v23 = vmul.f32 %v148_v21, %v148_v21 }
 0x1c8   :  { %v155_v24 = vsel %vm94_vm1, %v151_v22, 0.0 }
 0x1c9   :  { %156 = vadd.xlane.f32.xlu1 %v155_v24  ;;  %v152_v25 = vsel %vm94_vm1, %v150_v23, 0.0 }
 0x1ca   :  { %153 = vadd.xlane.f32.xlu0 %v152_v25 }
 0x221   :  { %v286_v26 = vpop.xlane.xlu0 %285 }
 0x222   :  { %v290_v27 = vmul.f32 0.03125, %v286_v26 }
 0x224   :  { %v292_v28 = vsub.f32 %v282_v8, %v290_v27 }
 0x225   :  { %v289_v29 = vpop.xlane.xlu1 %288 }
 0x226   :  { %v291_v30 = vmul.f32 0.03125, %v289_v29  ;;  %v294_v33 = vmul.f32 %v292_v28, %v292_v28 }
 0x228   :  { %v293_v34 = vsub.f32 %v283_v11, %v291_v30  ;;  %v296_v35 = vsel %vm94_vm1, %v294_v33, 0.0 }
 0x229   :  { %297 = vadd.xlane.f32.xlu0 %v296_v35 }
 0x22a   :  { %v295_v31 = vmul.f32 %v293_v34, %v293_v34 }
 0x22c   :  { %v299_v32 = vsel %vm94_vm1, %v295_v31, 0.0 }
 0x22d   :  { %300 = vadd.xlane.f32.xlu1 %v299_v32 }
 0x252   :  { %v157_v36 = vpop.xlane.xlu1 %156 }
 0x253   :  { %v159_v38 = vmul.f32 0.03125, %v157_v36  ;;  %v154_v39 = vpop.xlane.xlu0 %153 }
 0x254   :  { %v158_v40 = vmul.f32 0.03125, %v154_v39 }
 0x255   :  { %v161_v41 = vadd.f32 1e-05, %v159_v38 }
 0x256   :  { %v160_v42 = vadd.f32 1e-05, %v158_v40 }
 0x257   :  { %389 = vrsqrt.f32 %v161_v41 }
 0x258   :  { %391 = vrsqrt.f32 %v160_v42 }
 0x264   :  { %v390_v43 = vpop.eup %389 }
 0x265   :  { %v392_v44 = vpop.eup %391  ;;  %v165_v45 = vmul.f32 %v390_v43, %v149_v18 }
 0x266   :  { %v164_v46 = vmul.f32 %v392_v44, %v148_v21 }
 0x267   :  { %v171_v47 = vmul.f32 %v561_v19, %v165_v45 }
 0x268   :  { %v170_v48 = vmul.f32 %v561_v19, %v164_v46 }
 0x269   :  { %v177_v49 = vadd.f32 %v563_v20, %v171_v47 }
 0x26a   :  { %v176_v50 = vadd.f32 %v563_v20, %v170_v48 }
 0x2b2   :  { %v298_v51 = vpop.xlane.xlu0 %297 }
 0x2b3   :  { %v302_v52 = vmul.f32 0.03125, %v298_v51 }
 0x2b5   :  { %v304_v53 = vadd.f32 1e-05, %v302_v52 }
 0x2b6   :  { %v301_v54 = vpop.xlane.xlu1 %300 }
 0x2b7   :  { %393 = vrsqrt.f32 %v304_v53  ;;  %v303_v55 = vmul.f32 0.03125, %v301_v54 }
 0x2b9   :  { %v305_v56 = vadd.f32 1e-05, %v303_v55 }
 0x2bb   :  { %395 = vrsqrt.f32 %v305_v56 }
 0x2c4   :  { %v394_v60 = vpop.eup %393 }
 0x2c5   :  { %v308_v19 = vmul.f32 %v394_v60, %v292_v28 }
 0x2c7   :  { %v314_v62 = vmul.f32 %v313_v59, %v308_v19 }
 0x2c8   :  { %v396_v20 = vpop.eup %395 }
 0x2c9   :  { %v309_v63 = vmul.f32 %v396_v20, %v293_v34  ;;  %v320_v0 = vadd.f32 %v319_v61, %v314_v62 }
 0x2cb   :  { %v315_v2 = vmul.f32 %v313_v59, %v309_v63  ;;  %v322_v3 = vadd.f32 %v320_v0, %v176_v50 }
 0x2cd   :  { %v321_v4 = vadd.f32 %v319_v61, %v315_v2  ;;  %v326_v5 = vadd.f32 %v324_v1, %v322_v3 }
 0x2cf   :  { %v323_v7 = vadd.f32 %v321_v4, %v177_v49  ;;  %328 = vst.msk [vmem:[#allocation8] sm:$0xff] %vm94_vm1, %v326_v5 }
 0x2d1   :  { %v327_v15 = vadd.f32 %v325_v6, %v323_v7 }
 0x2d3   :  { %329 = vst.msk [vmem:[#allocation8 + $0x8] sm:$0xff] %vm94_vm1, %v327_v15 }
 0x2d4   :  { %468 = shalt.err (!%p465_p5)
}
 0x2d5   :  { %341 = dma.vmem_to_hbm [thread:$0]  %s336_s18, 256, %s606_s5, [#allocation4], %s484_s21, %s484_s21, %s485_s22  }
 0x2d6   :  { %481 = dma.done.wait [#allocation4], 256  }
 0x2d7   :  { %482 = vsyncadd [#allocation4], 4294967040 }
 0x2d8   :  { %345 = vsyncpa [#allocation3], 1 }
 0x2d9   :  { %346 = vsyncpa [#allocation6], 1 }
 0x2da   :  { %347 = vsyncpa [#allocation4], 1 }

// kernel: tpu_custom_call.1
= control target key start
LH: loop header
LB: loop body
LE: loop exit
PB: predicated region body
PF: predicated region fallthrough
CT: control target
= control target key end

     0   :  { %10 = vsyncpa [#allocation3], 0  ;;  %s601_s0 = inlined_call_operand.hbm [shape: bf16[16,32], index: 0, kind: input, shape index: {}]   ;;  %s602_s1 = inlined_call_operand.vmem [shape: f32[16,4], index: 1, kind: input, shape index: {}]   ;;  %s603_s2 = inlined_call_operand.vmem [shape: bf16[32,32], index: 2, kind: input, shape index: {}]   ;;  %s604_s3 = inlined_call_operand.hbm [shape: f32[16,32], index: 3, kind: input, shape index: {}]   ;;  %s605_s4 = inlined_call_operand.hbm [shape: f32[16,32], index: 4, kind: input, shape index: {}]   ;;  %s606_s5 = inlined_call_operand.hbm [shape: f32[16,32], index: 5, kind: output, shape index: {}]  }
   0x1   :  { %11 = vsyncpa [#allocation6], 0 }
   0x2   :  { %12 = vsyncpa [#allocation4], 0  ;;  %s483_s18 = smov [#allocation5]  }
   0x3   :  { %s34_s19 = sshll.u32 %s483_s18, 4  ;;  %s35_s19 = int_to_ptr.vmem [resolvable:$true] %s34_s19 }
   0x4   :  { %s405_s20 = scalar_lea.vmem %s35_s19, 256  ;;  %p410_p1 = scmp.lt.s32.totalorder %s35_s19, %s35_s19 }
   0x5   :  { %p406_p0 = scmp.ne.s32.totalorder %s35_s19, %s405_s20  ;;  %p411_p2 = scmp.lt.s32.totalorder %s405_s20, %s405_s20 }
   0x7   :  { %p412_p3 = por %p411_p2, %p410_p1 }
   0x9   :  { %p413_p4 = pnand %p412_p3, %p406_p0 }
   0xb   :  { %416 = shalt.err (!%p413_p4)
}
   0xc   :  { %s484_s21 = smov 128   ;;  %s485_s22 = smov 8  }
   0xd   :  { %40 = dma.hbm_to_vmem [thread:$0]  %s604_s3, 256, %s35_s19, [#allocation6], %s484_s21, %s484_s21, %s485_s22  }
   0xe   :  { %s486_s25 = smov [#allocation2]  }
   0xf   :  { %s18_s26 = sshll.u32 %s486_s25, 4  ;;  %s19_s26 = int_to_ptr.vmem [resolvable:$true] %s18_s26 }
  0x10   :  { %s425_s27 = scalar_lea.vmem %s19_s26, 128  ;;  %p430_p6 = scmp.lt.s32.totalorder %s19_s26, %s19_s26 }
  0x11   :  { %p426_p5 = scmp.ne.s32.totalorder %s19_s26, %s425_s27  ;;  %p431_p7 = scmp.lt.s32.totalorder %s425_s27, %s425_s27 }
  0x13   :  { %p432_p8 = por %p431_p7, %p430_p6 }
  0x15   :  { %p433_p9 = pnand %p432_p8, %p426_p5 }
  0x17   :  { %436 = shalt.err (!%p433_p9)
}
  0x18   :  { %s487_s28 = smov 64   ;;  %s488_s29 = smov 4  }
  0x19   :  { %24 = dma.hbm_to_vmem [thread:$0]  %s601_s0, 128, %s19_s26, [#allocation3], %s487_s28, %s487_s28, %s488_s29  }
  0x1a   :  { %s489_s7 = smov [#allocation7]  }
  0x1b   :  { %s46_s8 = sshll.u32 %s489_s7, 4  ;;  %s47_s8 = int_to_ptr.vmem [resolvable:$true] %s46_s8 }
  0x1c   :  { %s445_s3 = scalar_lea.vmem %s47_s8, 256  ;;  %p450_p11 = scmp.lt.s32.totalorder %s47_s8, %s47_s8 }
  0x1d   :  { %p446_p10 = scmp.ne.s32.totalorder %s47_s8, %s445_s3  ;;  %p451_p12 = scmp.lt.s32.totalorder %s445_s3, %s445_s3 }
  0x1f   :  { %p452_p13 = por %p451_p12, %p450_p11 }
  0x21   :  { %p453_p0 = pnand %p452_p13, %p446_p10 }
  0x23   :  { %456 = shalt.err (!%p453_p0)
}
  0x24   :  { %52 = dma.hbm_to_vmem [thread:$0]  %s605_s4, 256, %s47_s8, [#allocation6], %s484_s21, %s484_s21, %s485_s22  }
  0x25   :  { %477 = dma.done.wait [#allocation3], 128  }
  0x26   :  { %478 = vsyncadd [#allocation3], 4294967168 }
  0x27   :  { %479 = dma.done.wait [#allocation6], 512  }
  0x28   :  { %480 = vsyncadd [#allocation6], 4294966784  ;;  %v490_v0 = vmov 0.0   ;;  %vm491_vm0 = vmmov 0   ;;  %v492_v1 = vmov 0   ;;  %v65_v2 = vld [vmem:[%s602_s1] sm:$0xff]  ;;  %v73_v14 = vlaneseq }
  0x29   :  { %355 = vmatprep.subr.bf16.mxu0 %v490_v0  ;;  %359 = vmatprep.mubr.msk.bf16.mxu0 %vm491_vm0, %v490_v0  ;;  %s493_s12 = smov 1   ;;  %v386_v3 = vld [vmem:[%s603_s2 + $0x8] sm:$0xff]   ;;  %v387_v5 = vld [vmem:[%s603_s2] sm:$0xff]   ;;  %vm94_vm1 = vcmask 261120   ;;  %v494_v7 = vmov 1   ;;  %v495_v8 = vmov 3  }
  0x2a   :  { %380 = vset.pattern.permute.xlu1 %v492_v1  ;;  %379 = vset.pattern.permute.xlu0 %v492_v1  ;;  %v66_v4 = vld [vmem:[%s602_s1 + $0x8] sm:$0xff]  ;;  %v388_v6 = vld [vmem:[#allocation2] sm:$0xff]   ;;  %s496_s1 = smov 2   ;;  %v497_v13 = vmov 2   ;;  %v557_v15 = vshrl.u32 %v73_v14, 7  ;;  %v68_v18 = vld [vmem:[#allocation5 + $0x8] sm:$0xff] }
  0x2b   :  { %180 = vrot.lane.b32.xlu0 %v65_v2, %s493_s12  ;;  %356 = vmatpush3.bf16.msra.mxu0 %v386_v3  ;;  %v568_v37 = vld [vmem:[#allocation5] sm:$0xff]  ;;  %s498_s2 = smov [#allocation8]  }
  0x2c   :  { %357 = vmatprep.subr.bf16.mxu0 %v490_v0  ;;  %v168_v16 = vsub.s32 1, %v557_v15  ;;  %v174_v17 = vsub.s32 2, %v557_v15  ;;  %v75_v29 = vsub.s32 0, %v557_v15  ;;  %v254_v47 = vsub.s32 3, %v557_v15  ;;  %s335_s18 = sshll.u32 %s498_s2, 4  ;;  %s336_s18 = int_to_ptr.vmem [resolvable:$true] %s335_s18 }
  0x2d   :  { %v272_v48 = vsub.s32 4, %v557_v15  ;;  %v280_v57 = vsub.s32 5, %v557_v15  ;;  %s457_s19 = scalar_lea.vmem %s336_s18, 256  ;;  %p462_p2 = scmp.lt.s32.totalorder %s336_s18, %s336_s18 }
  0x2e   :  { %v561_v19 = vrot.slane %v68_v18, %v168_v16  ;;  %v563_v20 = vrot.slane %v68_v18, %v174_v17  ;;  %v76_v30 = vrot.slane %v68_v18, %v75_v29  ;;  %v209_v40 = vrot.slane %v568_v37, %v75_v29  ;;  %p458_p1 = scmp.ne.s32.totalorder %s336_s18, %s457_s19  ;;  %p463_p3 = scmp.lt.s32.totalorder %s457_s19, %s457_s19 }
  0x2f   :  { %182 = vrot.lane.b32.xlu0 %v66_v4, %s493_s12  ;;  %358 = vmatpush3.bf16.msra.mxu0 %v387_v5  ;;  %v223_v41 = vrot.slane %v568_v37, %v168_v16  ;;  %v239_v46 = vrot.slane %v568_v37, %v174_v17  ;;  %v255_v54 = vrot.slane %v568_v37, %v254_v47 }
  0x30   :  { %v273_v56 = vrot.slane %v568_v37, %v272_v48  ;;  %v281_v63 = vrot.slane %v568_v37, %v280_v57  ;;  %v312_v57 = vsub.s32 6, %v557_v15  ;;  %p464_p4 = por %p463_p3, %p462_p2 }
  0x32   :  { %360 = vmatmul.mubr.msk.bf16.vlgmr.msra.gmra.mxu0 %vm94_vm1, %v388_v6  ;;  %p465_p5 = pnand %p464_p4, %p458_p1 }
  0x33   :  { %199 = vperm.xlu0 %379, %v65_v2  }
  0x37   :  { %382 = vset.pattern.permute.xlu0 %v494_v7 }
  0x38   :  { %217 = vperm.xlu0 %382, %v66_v4  }
  0x3c   :  { %384 = vset.pattern.permute.xlu0 %v495_v8 }
  0x3d   :  { %245 = vperm.xlu0 %384, %v65_v2  }
  0x9d   :  { %v181_v9 = vpop.permute.xlu0 %180 }
  0x9e   :  { %v186_v10 = vsub.f32 %v65_v2, %v181_v9 }
  0xa0   :  { %190 = vrot.lane.b32.xlu1 %v186_v10, %s496_s1 }
  0xa1   :  { %v183_v11 = vpop.permute.xlu0 %182 }
  0xa2   :  { %v187_v12 = vsub.f32 %v66_v4, %v183_v11 }
  0xa4   :  { %192 = vrot.lane.b32.xlu1 %v187_v12, %s496_s1 }
  0xa8   :  { %203 = vperm.xlu1 %380, %v66_v4  }
  0xac   :  { %381 = vset.pattern.permute.xlu1 %v494_v7 }
  0xad   :  { %213 = vperm.xlu1 %381, %v65_v2  }
  0xae   :  { %v200_v39 = vpop.permute.xlu0 %199 }
  0xaf   :  { %v210_v43 = vmul.f32 %v209_v40, %v200_v39 }
  0xb1   :  { %383 = vset.pattern.permute.xlu1 %v497_v13 }
  0xb2   :  { %229 = vperm.xlu1 %383, %v65_v2  }
  0xb3   :  { %v218_v45 = vpop.permute.xlu0 %217 }
  0xb4   :  { %v225_v52 = vmul.f32 %v223_v41, %v218_v45 }
  0xb6   :  { %233 = vperm.xlu1 %383, %v66_v4  }
  0xb8   :  { %v246_v53 = vpop.permute.xlu0 %245 }
  0xb9   :  { %v256_v61 = vmul.f32 %v255_v54, %v246_v53 }
  0xba   :  { %385 = vset.pattern.permute.xlu1 %v495_v8 }
  0xbb   :  { %249 = vperm.xlu1 %385, %v66_v4  }
  0xf2   :  { %v132_v21 = vpop.f32.mrf.mxu0 }
  0xf3   :  { %v133_v32 = vadd.f32 %v132_v21, %v76_v30 }
  0xf4   :  { %v361_v22 = vpop.f32.mrf.mxu0 }
  0xf5   :  { %v139_v34 = vsel %vm94_vm1, %v133_v32, 0.0 }
  0xf6   :  { %v135_v23 = vpop.f32.mrf.mxu0 }
  0xf7   :  { %v136_v31 = vadd.f32 %v135_v23, %v76_v30 }
  0xf8   :  { %v362_v24 = vpop.f32.mrf.mxu0 }
  0xf9   :  { %v142_v33 = vsel %vm94_vm1, %v136_v31, 0.0 }
 0x112   :  { %v191_v25 = vpop.permute.xlu1 %190 }
 0x113   :  { %v196_v26 = vmul.f32 %v191_v25, %v186_v10 }
 0x115   :  { %262 = vperm.xlu1 %385, %v196_v26  }
 0x116   :  { %v193_v27 = vpop.permute.xlu1 %192 }
 0x117   :  { %v197_v28 = vmul.f32 %v193_v27, %v187_v12 }
 0x119   :  { %267 = vperm.xlu0 %384, %v197_v28  }
 0x123   :  { %v204_v35 = vpop.permute.xlu1 %203 }
 0x124   :  { %v211_v49 = vmul.f32 %v209_v40, %v204_v35 }
 0x126   :  { %v227_v59 = vadd.f32 %v225_v52, %v211_v49 }
 0x128   :  { %v214_v36 = vpop.permute.xlu1 %213 }
 0x129   :  { %v224_v42 = vmul.f32 %v223_v41, %v214_v36 }
 0x12b   :  { %v226_v51 = vadd.f32 %v224_v42, %v210_v43 }
 0x12d   :  { %v230_v38 = vpop.permute.xlu1 %229 }
 0x12e   :  { %v240_v50 = vmul.f32 %v239_v46, %v230_v38 }
 0x130   :  { %v242_v60 = vadd.f32 %v240_v50, %v226_v51 }
 0x131   :  { %v234_v44 = vpop.permute.xlu1 %233 }
 0x132   :  { %v241_v58 = vmul.f32 %v239_v46, %v234_v44  ;;  %v258_v2 = vadd.f32 %v256_v61, %v242_v60 }
 0x134   :  { %v243_v0 = vadd.f32 %v241_v58, %v227_v59  ;;  %v318_v58 = vsub.s32 7, %v557_v15  ;;  %v313_v59 = vrot.slane %v568_v37, %v312_v57 }
 0x136   :  { %v250_v55 = vpop.permute.xlu1 %249  ;;  %v319_v61 = vrot.slane %v568_v37, %v318_v58 }
 0x137   :  { %v257_v1 = vmul.f32 %v255_v54, %v250_v55 }
 0x138   :  { %143 = vadd.xlane.f32.xlu0 %v142_v33 }
 0x139   :  { %140 = vadd.xlane.f32.xlu1 %v139_v34  ;;  %v259_v6 = vadd.f32 %v257_v1, %v243_v0  ;;  %v324_v1 = vld [vmem:[#allocation7] sm:$0xff] }
 0x190   :  { %v263_v62 = vpop.permute.xlu1 %262 }
 0x191   :  { %v274_v3 = vmul.f32 %v273_v56, %v263_v62 }
 0x193   :  { %v276_v4 = vadd.f32 %v274_v3, %v258_v2 }
 0x194   :  { %v268_v5 = vpop.permute.xlu0 %267 }
 0x195   :  { %v275_v7 = vmul.f32 %v273_v56, %v268_v5  ;;  %v282_v8 = vadd.f32 %v281_v63, %v276_v4 }
 0x197   :  { %v277_v9 = vadd.f32 %v275_v7, %v259_v6  ;;  %v284_v10 = vsel %vm94_vm1, %v282_v8, 0.0  ;;  %v325_v6 = vld [vmem:[#allocation7 + $0x8] sm:$0xff] }
 0x198   :  { %285 = vadd.xlane.f32.xlu0 %v284_v10 }
 0x199   :  { %v283_v11 = vadd.f32 %v281_v63, %v277_v9 }
 0x19b   :  { %v287_v12 = vsel %vm94_vm1, %v283_v11, 0.0 }
 0x19c   :  { %288 = vadd.xlane.f32.xlu1 %v287_v12 }
 0x1c1   :  { %v144_v13 = vpop.xlane.xlu0 %143 }
 0x1c2   :  { %v147_v14 = vmul.f32 0.03125, %v144_v13  ;;  %v141_v16 = vpop.xlane.xlu1 %140 }
 0x1c3   :  { %v146_v17 = vmul.f32 0.03125, %v141_v16 }
 0x1c4   :  { %v149_v18 = vsub.f32 %v136_v31, %v147_v14 }
 0x1c5   :  { %v148_v21 = vsub.f32 %v133_v32, %v146_v17 }
 0x1c6   :  { %v151_v22 = vmul.f32 %v149_v18, %v149_v18 }
 0x1c7   :  { %v150_v23 = vmul.f32 %v148_v21, %v148_v21 }
 0x1c8   :  { %v155_v24 = vsel %vm94_vm1, %v151_v22, 0.0 }
 0x1c9   :  { %156 = vadd.xlane.f32.xlu1 %v155_v24  ;;  %v152_v25 = vsel %vm94_vm1, %v150_v23, 0.0 }
 0x1ca   :  { %153 = vadd.xlane.f32.xlu0 %v152_v25 }
 0x221   :  { %v286_v26 = vpop.xlane.xlu0 %285 }
 0x222   :  { %v290_v27 = vmul.f32 0.03125, %v286_v26 }
 0x224   :  { %v292_v28 = vsub.f32 %v282_v8, %v290_v27 }
 0x225   :  { %v289_v29 = vpop.xlane.xlu1 %288 }
 0x226   :  { %v291_v30 = vmul.f32 0.03125, %v289_v29  ;;  %v294_v33 = vmul.f32 %v292_v28, %v292_v28 }
 0x228   :  { %v293_v34 = vsub.f32 %v283_v11, %v291_v30  ;;  %v296_v35 = vsel %vm94_vm1, %v294_v33, 0.0 }
 0x229   :  { %297 = vadd.xlane.f32.xlu0 %v296_v35 }
 0x22a   :  { %v295_v31 = vmul.f32 %v293_v34, %v293_v34 }
 0x22c   :  { %v299_v32 = vsel %vm94_vm1, %v295_v31, 0.0 }
 0x22d   :  { %300 = vadd.xlane.f32.xlu1 %v299_v32 }
 0x252   :  { %v157_v36 = vpop.xlane.xlu1 %156 }
 0x253   :  { %v159_v38 = vmul.f32 0.03125, %v157_v36  ;;  %v154_v39 = vpop.xlane.xlu0 %153 }
 0x254   :  { %v158_v40 = vmul.f32 0.03125, %v154_v39 }
 0x255   :  { %v161_v41 = vadd.f32 1e-05, %v159_v38 }
 0x256   :  { %v160_v42 = vadd.f32 1e-05, %v158_v40 }
 0x257   :  { %389 = vrsqrt.f32 %v161_v41 }
 0x258   :  { %391 = vrsqrt.f32 %v160_v42 }
 0x264   :  { %v390_v43 = vpop.eup %389 }
 0x265   :  { %v392_v44 = vpop.eup %391  ;;  %v165_v45 = vmul.f32 %v390_v43, %v149_v18 }
 0x266   :  { %v164_v46 = vmul.f32 %v392_v44, %v148_v21 }
 0x267   :  { %v171_v47 = vmul.f32 %v561_v19, %v165_v45 }
 0x268   :  { %v170_v48 = vmul.f32 %v561_v19, %v164_v46 }
 0x269   :  { %v177_v49 = vadd.f32 %v563_v20, %v171_v47 }
 0x26a   :  { %v176_v50 = vadd.f32 %v563_v20, %v170_v48 }
 0x2b2   :  { %v298_v51 = vpop.xlane.xlu0 %297 }
 0x2b3   :  { %v302_v52 = vmul.f32 0.03125, %v298_v51 }
 0x2b5   :  { %v304_v53 = vadd.f32 1e-05, %v302_v52 }
 0x2b6   :  { %v301_v54 = vpop.xlane.xlu1 %300 }
 0x2b7   :  { %393 = vrsqrt.f32 %v304_v53  ;;  %v303_v55 = vmul.f32 0.03125, %v301_v54 }
 0x2b9   :  { %v305_v56 = vadd.f32 1e-05, %v303_v55 }
 0x2bb   :  { %395 = vrsqrt.f32 %v305_v56 }
 0x2c4   :  { %v394_v60 = vpop.eup %393 }
 0x2c5   :  { %v308_v19 = vmul.f32 %v394_v60, %v292_v28 }
 0x2c7   :  { %v314_v62 = vmul.f32 %v313_v59, %v308_v19 }
 0x2c8   :  { %v396_v20 = vpop.eup %395 }
 0x2c9   :  { %v309_v63 = vmul.f32 %v396_v20, %v293_v34  ;;  %v320_v0 = vadd.f32 %v319_v61, %v314_v62 }
 0x2cb   :  { %v315_v2 = vmul.f32 %v313_v59, %v309_v63  ;;  %v322_v3 = vadd.f32 %v320_v0, %v176_v50 }
 0x2cd   :  { %v321_v4 = vadd.f32 %v319_v61, %v315_v2  ;;  %v326_v5 = vadd.f32 %v324_v1, %v322_v3 }
 0x2cf   :  { %v323_v7 = vadd.f32 %v321_v4, %v177_v49  ;;  %328 = vst.msk [vmem:[#allocation8] sm:$0xff] %vm94_vm1, %v326_v5 }
 0x2d1   :  { %v327_v15 = vadd.f32 %v325_v6, %v323_v7 }
 0x2d3   :  { %329 = vst.msk [vmem:[#allocation8 + $0x8] sm:$0xff] %vm94_vm1, %v327_v15 }
 0x2d4   :  { %468 = shalt.err (!%p465_p5)
}
 0x2d5   :  { %341 = dma.vmem_to_hbm [thread:$0]  %s336_s18, 256, %s606_s5, [#allocation4], %s484_s21, %s484_s21, %s485_s22  }
 0x2d6   :  { %481 = dma.done.wait [#allocation4], 256  }
 0x2d7   :  { %482 = vsyncadd [#allocation4], 4294967040 }
 0x2d8   :  { %345 = vsyncpa [#allocation3], 1 }
 0x2d9   :  { %346 = vsyncpa [#allocation6], 1 }
 0x2da   :  { %347 = vsyncpa [#allocation4], 1 }

</bundles_post_ra>
